<compile_context>
chip_gen: v5e
topology: v5e:2x2
jax: 0.10.0
libtpu: 0.0.40
codegen_flags: <defaults>
</compile_context>

<pallas_src>
import functools

import jax
import jax.numpy as jnp
from jax.experimental import pallas as pl
from jax.experimental.pallas import tpu as pltpu

BN_EPS = 1e-5

_MIB = 1024 * 1024
# Phase-2 double-buffered (x tile + out tile) budget; conservative for v7x's
# 64 MiB physical VMEM while still allowing very large length tiles.
_TILE_VMEM_BUDGET = 20 * _MIB
# Largest VMEM limit ever requested (stays well under v7x's 64 MiB physical).
_VMEM_LIMIT_CAP = 56 * _MIB


def _round_down(v, m):
    return (v // m) * m


# ----------------------------------------------------------------------------
# Fused path: whole x (and output) resident in VMEM, single kernel invocation.
# ----------------------------------------------------------------------------
def _fused_kernel(x_ref, w_ref, gamma_ref, beta_ref, o_ref, *, inv_n):
    w = w_ref[...]                                   # (Cout, Cin)
    cout = w.shape[0]
    batch = x_ref.shape[0]

    def stats_body(bi, carry):
        s, sq = carry
        y = jnp.dot(w, x_ref[bi], preferred_element_type=jnp.float32)  # (Cout, L)
        o_ref[bi] = y
        return (s + jnp.sum(y, axis=1, keepdims=True),
                sq + jnp.sum(y * y, axis=1, keepdims=True))

    zeros = jnp.zeros((cout, 1), jnp.float32)
    s, sq = jax.lax.fori_loop(0, batch, stats_body, (zeros, zeros))

    mean = s * inv_n
    var = jnp.maximum(sq * inv_n - mean * mean, 0.0)          # biased variance
    scale = gamma_ref[...] * jax.lax.rsqrt(var + BN_EPS)      # (Cout, 1)
    shift = beta_ref[...] - scale * mean                      # (Cout, 1)

    def norm_body(bi, _):
        o_ref[bi] = o_ref[bi] * scale + shift
        return 0

    jax.lax.fori_loop(0, batch, norm_body, 0)


# ----------------------------------------------------------------------------
# Tiled path, phase 1: per-tile x statistics (no y materialized).
# ----------------------------------------------------------------------------
def _stats_kernel(x_ref, g_ref, s_ref, *, tile_l, length, n_l):
    # x_ref: (1, Cin, TL)
    # g_ref: (1, 1, Cin, Cin)   per-tile Gram matrix  x @ x.T   (MXU, K = TL)
    # s_ref: (1, 1, Cin, lanes) per-tile per-lane partial sums  (VPU adds)

    def emit(xv):
        # Gram matrix on the MXU: contract the (long) length axis of both
        # operands -- the same lowering pattern as q @ k.T in flash attention.
        g_ref[0, 0] = jax.lax.dot_general(
            xv, xv, (((1,), (1,)), ((), ())),
            preferred_element_type=jnp.float32)
        if tile_l % 128 == 0:
            # Lane-aligned chunked VPU adds: no per-tile cross-lane XLU reduce.
            psum = xv[:, 0:128]
            for j in range(1, tile_l // 128):
                psum = psum + xv[:, j * 128:(j + 1) * 128]
        else:
            # Tiny non-aligned tile (tile_l == L < 128): one XLU reduce is fine.
            psum = jnp.sum(xv, axis=1, keepdims=True)
        s_ref[0, 0] = psum

    if length % tile_l == 0:
        emit(x_ref[0])
    else:
        li = pl.program_id(1)

        @pl.when(li < n_l - 1)
        def _():
            emit(x_ref[0])

        @pl.when(li == n_l - 1)
        def _():
            # Only the single partial tile pays for the mask; padded lanes hold
            # uninitialized data, so use a select (never a multiply-by-mask).
            xv = x_ref[0]
            col = jax.lax.broadcasted_iota(jnp.int32, xv.shape, 1)
            emit(jnp.where(li * tile_l + col < length, xv, 0.0))


# ----------------------------------------------------------------------------
# Tiled path, phase 2: y = W_scaled @ x + shift  (BN scale folded into weight).
# ----------------------------------------------------------------------------
def _norm_kernel(x_ref, ws_ref, shift_ref, o_ref):
    y = jnp.dot(ws_ref[...], x_ref[0], preferred_element_type=jnp.float32)
    o_ref[0] = (y + shift_ref[...]).astype(o_ref.dtype)


def mapping_forward(x, w, b, gamma, beta, *,
                    max_tile_l=8192, max_fused_bytes=10 * _MIB):
    """x: (B, Cin, L) float -> (B, Cout, L) float32. Conv1d(k=1) + BN (train)."""
    B, Cin, L = x.shape
    Cout = w.shape[0]

    x = x.astype(jnp.float32)
    w2 = w.reshape(Cout, Cin).astype(jnp.float32)
    gamma_f = gamma.astype(jnp.float32)
    beta_f = beta.astype(jnp.float32)
    # Conv bias is a per-channel constant; training-mode BatchNorm subtracts the
    # batch mean, so the bias cancels exactly and never needs to touch the device.
    # TODO(synk): BatchNorm1d running_mean/running_var buffer updates (training
    # side effect) are not reproduced; only the forward output is.
    del b

    # ------------------ Fused path: x + output resident in VMEM -------------
    fused_bytes = 4 * (B * (Cin + Cout) * L + Cout * (Cin + 2))
    if fused_bytes <= max_fused_bytes:
        vmem_limit = int(min(max(fused_bytes + 4 * _MIB, 16 * _MIB),
                             _VMEM_LIMIT_CAP))
        return pl.pallas_call(
            functools.partial(_fused_kernel, inv_n=1.0 / float(B * L)),
            out_shape=jax.ShapeDtypeStruct((B, Cout, L), jnp.float32),
            compiler_params=pltpu.CompilerParams(vmem_limit_bytes=vmem_limit),
            cost_estimate=pl.CostEstimate(
                flops=2 * B * Cout * Cin * L + 5 * B * Cout * L,
                transcendentals=Cout,
                bytes_accessed=4 * (B * Cin * L + B * Cout * L + Cout * Cin)),
        )(x, w2, gamma_f.reshape(Cout, 1), beta_f.reshape(Cout, 1))

    # ------------------ Tiled two-phase path ---------------------------------
    # Length tile: as large as possible (per-grid-step overhead ~0.35 us) while
    # keeping phase-2's double-buffered (x + out) tiles under the VMEM budget.
    budget_tl = max(128, _round_down(_TILE_VMEM_BUDGET // (8 * (Cin + Cout)), 128))
    if L <= min(max_tile_l, budget_tl):
        tile_l = L
    else:
        tile_l = max(128, _round_down(min(max_tile_l, budget_tl), 128))
    n_l = -(-L // tile_l)
    grid = (B, n_l)
    lanes = 128 if tile_l % 128 == 0 else 1

    vmem_limit = int(min(max(8 * (Cin + Cout) * tile_l + 4 * Cout * Cin + 4 * _MIB,
                             16 * _MIB), _VMEM_LIMIT_CAP))

    x_spec = pl.BlockSpec((1, Cin, tile_l), lambda bi, li: (bi, 0, li))

    # ---- Phase 1: per-tile Gram + per-lane sums of x (fully parallel) -------
    g_parts, s_parts = pl.pallas_call(
        functools.partial(_stats_kernel, tile_l=tile_l, length=L, n_l=n_l),
        grid=grid,
        in_specs=[x_spec],
        out_specs=[
            pl.BlockSpec((1, 1, Cin, Cin), lambda bi, li: (bi, li, 0, 0)),
            pl.BlockSpec((1, 1, Cin, lanes), lambda bi, li: (bi, li, 0, 0)),
        ],
        out_shape=[
            jax.ShapeDtypeStruct((B, n_l, Cin, Cin), jnp.float32),
            jax.ShapeDtypeStruct((B, n_l, Cin, lanes), jnp.float32),
        ],
        compiler_params=pltpu.CompilerParams(
            dimension_semantics=("parallel", "parallel"),
            vmem_limit_bytes=vmem_limit),
        cost_estimate=pl.CostEstimate(
            flops=2 * B * Cin * Cin * L + B * Cin * L,
            transcendentals=0,
            bytes_accessed=4 * (B * Cin * L + B * n_l * Cin * (Cin + lanes))),
    )(x)

    # ---- Tiny epilogue: recover y stats, fold Conv + BN into W_scaled/shift -
    n = jnp.float32(B * L)
    g_sum = jnp.sum(g_parts, axis=(0, 1))                    # (Cin, Cin)
    sx = jnp.sum(s_parts, axis=(0, 1, 3))                    # (Cin,)
    sum_y = w2 @ sx                                          # (Cout,)
    sumsq_y = jnp.sum((w2 @ g_sum) * w2, axis=1)             # (Cout,)
    mean = sum_y / n
    var = jnp.maximum(sumsq_y / n - mean * mean, 0.0)        # biased variance
    scale = gamma_f * jax.lax.rsqrt(var + BN_EPS)            # (Cout,)
    shift = (beta_f - scale * mean).reshape(Cout, 1)         # (Cout, 1)
    w_scaled = scale[:, None] * w2                           # fold BN scale into W

    # ---- Phase 2: normalize, fully parallel over (batch, length tiles) ------
    out = pl.pallas_call(
        _norm_kernel,
        grid=grid,
        in_specs=[x_spec,
                  pl.BlockSpec((Cout, Cin), lambda bi, li: (0, 0)),
                  pl.BlockSpec((Cout, 1), lambda bi, li: (0, 0))],
        out_specs=pl.BlockSpec((1, Cout, tile_l), lambda bi, li: (bi, 0, li)),
        out_shape=jax.ShapeDtypeStruct((B, Cout, L), jnp.float32),
        compiler_params=pltpu.CompilerParams(
            dimension_semantics=("parallel", "parallel"),
            vmem_limit_bytes=vmem_limit),
        cost_estimate=pl.CostEstimate(
            flops=2 * B * Cout * Cin * L + B * Cout * L,
            transcendentals=0,
            bytes_accessed=4 * (B * Cin * L + B * Cout * L + Cout * (Cin + 1))),
    )(x, w_scaled, shift)

    return out


def _reference(x, w, b, gamma, beta):
    """Pure-JAX reference matching PyTorch Conv1d(k=1) + BatchNorm1d (train)."""
    Cout = w.shape[0]
    y = jnp.einsum("bcl,oc->bol", x, w.reshape(Cout, -1)) + b[None, :, None]
    mean = jnp.mean(y, axis=(0, 2), keepdims=True)
    var = jnp.mean((y - mean) ** 2, axis=(0, 2), keepdims=True)
    return gamma[None, :, None] * (y - mean) / jnp.sqrt(var + BN_EPS) \
        + beta[None, :, None]


if __name__ == "__main__":
    B, Cin, Cout, L = 2, 16, 32, 128

    key = jax.random.PRNGKey(0)
    kx, kw, kb, kg, kbt, kx2, kx3 = jax.random.split(key, 7)

    x = jax.random.normal(kx, (B, Cin, L), dtype=jnp.float32)
    # Parameter shapes from nn.Conv1d / nn.BatchNorm1d.
    w = jax.random.normal(kw, (Cout, Cin, 1), dtype=jnp.float32) * 0.1
    b = jax.random.normal(kb, (Cout,), dtype=jnp.float32) * 0.1
    gamma = 1.0 + 0.1 * jax.random.normal(kg, (Cout,), dtype=jnp.float32)
    beta = 0.1 * jax.random.normal(kbt, (Cout,), dtype=jnp.float32)

    # 1) Fused single-kernel path (x resident in VMEM).
    out = mapping_forward(x, w, b, gamma, beta)
    jax.block_until_ready(out)
    ref = _reference(x, w, b, gamma, beta)
    assert out.shape == (B, Cout, L)
    assert jnp.allclose(out, ref, atol=1e-4, rtol=1e-4), \
        float(jnp.max(jnp.abs(out - ref)))

    # 2) Tiled two-phase path with aligned tiles (chunked per-lane accumulation).
    L2 = 512
    x2 = jax.random.normal(kx2, (B, Cin, L2), dtype=jnp.float32)
    out2 = mapping_forward(x2, w, b, gamma, beta,
                           max_tile_l=256, max_fused_bytes=0)
    jax.block_until_ready(out2)
    ref2 = _reference(x2, w, b, gamma, beta)
    assert out2.shape == (B, Cout, L2)
    assert jnp.allclose(out2, ref2, atol=1e-4, rtol=1e-4), \
        float(jnp.max(jnp.abs(out2 - ref2)))

    # 3) Tiled path with a partial (masked) last length tile.
    L3 = 200
    x3 = jax.random.normal(kx3, (B, Cin, L3), dtype=jnp.float32)
    out3 = mapping_forward(x3, w, b, gamma, beta,
                           max_tile_l=128, max_fused_bytes=0)
    jax.block_until_ready(out3)
    ref3 = _reference(x3, w, b, gamma, beta)
    assert out3.shape == (B, Cout, L3)
    assert jnp.allclose(out3, ref3, atol=1e-4, rtol=1e-4), \
        float(jnp.max(jnp.abs(out3 - ref3)))

    print("KERNEL_OK")
</pallas_src>

<mosaic_0001>
module attributes {stable_mosaic.version = 11 : i64} {
  func.func @_fused_kernel(%arg0: memref<2x16x128xf32, #tpu.memory_space<vmem>>, %arg1: memref<32x16xf32, #tpu.memory_space<vmem>>, %arg2: memref<32x1xf32, #tpu.memory_space<vmem>>, %arg3: memref<32x1xf32, #tpu.memory_space<vmem>>, %arg4: memref<2x32x128xf32, #tpu.memory_space<vmem>>) attributes {dimension_semantics = [], scalar_prefetch = 0 : i64, scratch_operands = 0 : i64, tpu.core_type = #tpu.core_type<tc>} {
    %c0 = arith.constant 0 : index
    %c0_0 = arith.constant 0 : index
    %0 = vector.load %arg1[%c0, %c0_0] : memref<32x16xf32, #tpu.memory_space<vmem>>, vector<32x16xf32>
    %cst = arith.constant 0.000000e+00 : f32
    %1 = vector.broadcast %cst : f32 to vector<32x1xf32>
    %c0_i32 = arith.constant 0 : i32
    %c2_i32 = arith.constant 2 : i32
    %2 = arith.addi %c0_i32, %c2_i32 : i32
    %c1_i32 = arith.constant 1 : i32
    %3:2 = scf.for %arg5 = %c0_i32 to %2 step %c1_i32 iter_args(%arg6 = %1, %arg7 = %1) -> (vector<32x1xf32>, vector<32x1xf32>)  : i32 {
      %21 = arith.index_cast %arg5 : i32 to index
      %c0_14 = arith.constant 0 : index
      %c0_15 = arith.constant 0 : index
      %22 = vector.load %arg0[%21, %c0_14, %c0_15] : memref<2x16x128xf32, #tpu.memory_space<vmem>>, vector<1x16x128xf32>
      %23 = vector.shape_cast %22 : vector<1x16x128xf32> to vector<16x128xf32>
      %cst_16 = arith.constant dense<0.000000e+00> : vector<32x128xf32>
      %24 = tpu.matmul %0, %23, %cst_16 {dimension_numbers = #tpu.dot_dimension_numbers<[1], [0], [0], [1], [0, 0, 1, 1], [], []>} : vector<32x16xf32>, vector<16x128xf32>, vector<32x128xf32> -> vector<32x128xf32>
      %25 = arith.index_cast %arg5 : i32 to index
      %c0_17 = arith.constant 0 : index
      %c0_18 = arith.constant 0 : index
      %26 = vector.load %arg4[%25, %c0_17, %c0_18] : memref<2x32x128xf32, #tpu.memory_space<vmem>>, vector<1x32x128xf32>
      %27 = vector.shape_cast %26 : vector<1x32x128xf32> to vector<32x128xf32>
      %28 = vector.shape_cast %24 : vector<32x128xf32> to vector<1x32x128xf32>
      tpu.vector_store %arg4[%25, %c0_17, %c0_18], %28 {strides = array<i32>} : memref<2x32x128xf32, #tpu.memory_space<vmem>>, vector<1x32x128xf32>,
      %cst_19 = arith.constant dense<0.000000e+00> : vector<32xf32>
      %29 = vector.multi_reduction <add>, %24, %cst_19 [1] : vector<32x128xf32> to vector<32xf32>
      %30 = vector.shape_cast %29 : vector<32xf32> to vector<32x1xf32>
      %31 = arith.addf %arg6, %30 : vector<32x1xf32>
      %32 = arith.mulf %24, %24 : vector<32x128xf32>
      %cst_20 = arith.constant dense<0.000000e+00> : vector<32xf32>
      %33 = vector.multi_reduction <add>, %32, %cst_20 [1] : vector<32x128xf32> to vector<32xf32>
      %34 = vector.shape_cast %33 : vector<32xf32> to vector<32x1xf32>
      %35 = arith.addf %arg7, %34 : vector<32x1xf32>
      scf.yield %31, %35 : vector<32x1xf32>, vector<32x1xf32>
    }
    %c2_i32_1 = arith.constant 2 : i32
    %cst_2 = arith.constant 3.906250e-03 : f32
    %4 = vector.broadcast %cst_2 : f32 to vector<32x1xf32>
    %5 = arith.mulf %3#0, %4 : vector<32x1xf32>
    %cst_3 = arith.constant 3.906250e-03 : f32
    %6 = vector.broadcast %cst_3 : f32 to vector<32x1xf32>
    %7 = arith.mulf %3#1, %6 : vector<32x1xf32>
    %8 = arith.mulf %5, %5 : vector<32x1xf32>
    %9 = arith.subf %7, %8 : vector<32x1xf32>
    %cst_4 = arith.constant 0.000000e+00 : f32
    %10 = vector.broadcast %cst_4 : f32 to vector<32x1xf32>
    %11 = arith.maximumf %9, %10 : vector<32x1xf32>
    %c0_5 = arith.constant 0 : index
    %c0_6 = arith.constant 0 : index
    %12 = vector.load %arg2[%c0_5, %c0_6] : memref<32x1xf32, #tpu.memory_space<vmem>>, vector<32x1xf32>
    %cst_7 = arith.constant 9.99999974E-6 : f32
    %13 = vector.broadcast %cst_7 : f32 to vector<32x1xf32>
    %14 = arith.addf %11, %13 : vector<32x1xf32>
    %15 = math.rsqrt %14 : vector<32x1xf32>
    %16 = arith.mulf %12, %15 : vector<32x1xf32>
    %c0_8 = arith.constant 0 : index
    %c0_9 = arith.constant 0 : index
    %17 = vector.load %arg3[%c0_8, %c0_9] : memref<32x1xf32, #tpu.memory_space<vmem>>, vector<32x1xf32>
    %18 = arith.mulf %16, %5 : vector<32x1xf32>
    %19 = arith.subf %17, %18 : vector<32x1xf32>
    %c0_i32_10 = arith.constant 0 : i32
    %c2_i32_11 = arith.constant 2 : i32
    %20 = arith.addi %c0_i32_10, %c2_i32_11 : i32
    %c1_i32_12 = arith.constant 1 : i32
    scf.for %arg5 = %c0_i32_10 to %20 step %c1_i32_12  : i32 {
      %21 = arith.index_cast %arg5 : i32 to index
      %c0_14 = arith.constant 0 : index
      %c0_15 = arith.constant 0 : index
      %22 = vector.load %arg4[%21, %c0_14, %c0_15] : memref<2x32x128xf32, #tpu.memory_space<vmem>>, vector<1x32x128xf32>
      %23 = vector.shape_cast %22 : vector<1x32x128xf32> to vector<32x128xf32>
      %24 = vector.broadcast %16 : vector<32x1xf32> to vector<32x128xf32>
      %25 = arith.mulf %23, %24 : vector<32x128xf32>
      %26 = vector.broadcast %19 : vector<32x1xf32> to vector<32x128xf32>
      %27 = arith.addf %25, %26 : vector<32x128xf32>
      %28 = arith.index_cast %arg5 : i32 to index
      %c0_16 = arith.constant 0 : index
      %c0_17 = arith.constant 0 : index
      %29 = vector.load %arg4[%28, %c0_16, %c0_17] : memref<2x32x128xf32, #tpu.memory_space<vmem>>, vector<1x32x128xf32>
      %30 = vector.shape_cast %29 : vector<1x32x128xf32> to vector<32x128xf32>
      %31 = vector.shape_cast %27 : vector<32x128xf32> to vector<1x32x128xf32>
      tpu.vector_store %arg4[%28, %c0_16, %c0_17], %31 {strides = array<i32>} : memref<2x32x128xf32, #tpu.memory_space<vmem>>, vector<1x32x128xf32>,
    }
    %c2_i32_13 = arith.constant 2 : i32
    return
  }
}

</mosaic_0001>

<bundles_post_ra>
// kernel: tpu_custom_call.1
= control target key start
LH: loop header
LB: loop body
LE: loop exit
PB: predicated region body
PF: predicated region fallthrough
CT: control target
= control target key end

     0   :  { %9 = vsyncpa [#allocation3], 0  ;;  %v585_v4 = vmov 0.0   ;;  %v587_v5 = vmov 0.0   ;;  %v589_v6 = vmov 0.0   ;;  %v591_v7 = vmov 0.0   ;;  %s711_s0 = inlined_call_operand.vmem [shape: f32[2,16,128], index: 0, kind: input, shape index: {}]   ;;  %s712_s1 = inlined_call_operand.vmem [shape: f32[32,16], index: 1, kind: input, shape index: {}]   ;;  %s713_s2 = inlined_call_operand.vmem [shape: f32[32,1], index: 2, kind: input, shape index: {}]   ;;  %s714_s3 = inlined_call_operand.vmem [shape: f32[32,1], index: 3, kind: input, shape index: {}]   ;;  %s715_s4 = inlined_call_operand.hbm [shape: f32[2,32,128], index: 4, kind: output, shape index: {}]  }
   0x1   :  { %v568_v0 = vld [vmem:[%s712_s1] sm:$0xff]  ;;  %v573_v1 = vld [vmem:[%s712_s1 + $0x8] sm:$0xff]  ;;  %v578_v2 = vld [vmem:[%s712_s1 + $0x10] sm:$0xff]  ;;  %v593_v8 = vmov 0.0   ;;  %v595_v9 = vmov 0.0   ;;  %v597_v10 = vmov 0.0  }
   0x2   :  { %v583_v3 = vld [vmem:[%s712_s1 + $0x18] sm:$0xff]  ;;  %v599_v11 = vmov 0.0   ;;  %s601_s23 = smov 0  }
   0x3 LB: > { %s322_s1 = sshll.u32 %s530_s23, 4  ;;  %vm40_vm0 = vcmask 130048   ;;  %s327_s27 = sshll.u32 %s530_s23, 5  ;;  %s530_s23 = sphi %s601_s23, %s27_s23   ;;  %v526_v11 = vphi %v599_v11, %v723_v11   ;;  %v522_v10 = vphi %v597_v10, %v722_v10   ;;  %v518_v9 = vphi %v595_v9, %v721_v9   ;;  %v514_v8 = vphi %v593_v8, %v720_v8   ;;  %v510_v7 = vphi %v591_v7, %v719_v7   ;;  %v506_v6 = vphi %v589_v6, %v718_v6   ;;  %v502_v5 = vphi %v587_v5, %v717_v5   ;;  %v498_v4 = vphi %v585_v4, %v716_v4  }
   0x4   : > { %s37_s26 = scalar_lea.vmem %s711_s0, %s322_s1  ;;  %s83_s28 = scalar_lea.vmem [#allocation2], %s327_s27 }
   0x5   : > { %v39_v12 = vld [vmem:[%s37_s26 + $0x8] sm:$0xff]  ;;  %v38_v13 = vld [vmem:[%s37_s26] sm:$0xff]  ;;  %s27_s23 = sadd.s32 1, %s530_s23  }
   0x6   : > { %67 = vmatpush.msra.mxu0 %v39_v12  ;;  %330 = vmatpush.msra.mxu2 %v39_v12  ;;  %p24_p0 = scmp.ge.s32.totalorder %s27_s23, 2  }
   0x7   : > { %329 = vmatpush.msra.mxu1 %v39_v12  ;;  %331 = vmatpush.msra.mxu3 %v39_v12  ;;  %s698_s17 = smov (%p24_p0), 0  }
   0x8   : > { %68 = vmatpush.msra.mxu0 %v38_v13  ;;  %333 = vmatpush.msra.mxu2 %v38_v13 }
   0x9   : > { %323 = vmatmul.msk.f32.vlgmr.msra.gmra.mxu0 %vm40_vm0, %v568_v0  ;;  %325 = vmatmul.msk.f32.vlgmr.msra.gmra.mxu2 %vm40_vm0, %v578_v2 }
   0xa   : > { %332 = vmatpush.msra.mxu1 %v38_v13  ;;  %334 = vmatpush.msra.mxu3 %v38_v13 }
   0xb   : > { %324 = vmatmul.msk.f32.vlgmr.msra.gmra.mxu1 %vm40_vm0, %v573_v1  ;;  %326 = vmatmul.msk.f32.vlgmr.msra.gmra.mxu3 %vm40_vm0, %v583_v3 }
  0x86   : > { %v70_v14 = vpop.f32.mrf.mxu0 }
  0x87   : > { %84 = vst [vmem:[%s83_s28] sm:$0xff] %v70_v14  ;;  %88 = vadd.xlane.f32.xlu0 %v70_v14  ;;  %v100_v15 = vmul.f32 %v70_v14, %v70_v14 }
  0x88   : > { %v73_v16 = vpop.f32.mrf.mxu1 }
  0x89   : > { %85 = vst [vmem:[%s83_s28 + $0x8] sm:$0xff] %v73_v16  ;;  %104 = vadd.xlane.f32.xlu2 %v100_v15  ;;  %v101_v18 = vmul.f32 %v73_v16, %v73_v16 }
  0x8c   : > { %v76_v17 = vpop.f32.mrf.mxu2 }
  0x8d   : > { %86 = vst [vmem:[%s83_s28 + $0x10] sm:$0xff] %v76_v17  ;;  %92 = vadd.xlane.f32.xlu1 %v76_v17  ;;  %v102_v20 = vmul.f32 %v76_v17, %v76_v17  ;;  %v136_v17 = vld [vmem:[%s713_s2] sm:$0xff] (%p24_p0) }
  0x8e   : > { %v79_v19 = vpop.f32.mrf.mxu3 }
  0x8f   : > { %90 = vadd.xlane.f32.xlu0 %v73_v16  ;;  %87 = vst [vmem:[%s83_s28 + $0x18] sm:$0xff] %v79_v19  ;;  %v103_v21 = vmul.f32 %v79_v19, %v79_v19 }
  0x91   : > { %106 = vadd.xlane.f32.xlu2 %v101_v18 }
  0x95   : > { %94 = vadd.xlane.f32.xlu1 %v79_v19 }
  0x97   : > { %108 = vadd.xlane.f32.xlu0 %v102_v20  ;;  %v137_v20 = vld [vmem:[%s713_s2 + $0x8] sm:$0xff] (%p24_p0) }
  0x9d   : > { %110 = vadd.xlane.f32.xlu1 %v103_v21 }
  0xfa   : > { %v89_v22 = vpop.xlane.xlu0 %88 }
  0xfb   : > { %v96_v23 = vadd.f32 %v526_v11, %v89_v22  }
  0xfc   : > { %v105_v24 = vpop.xlane.xlu2 %104 }
  0xfd   : > { %v112_v25 = vadd.f32 %v510_v7, %v105_v24   ;;  %v723_v11 = vmov %v96_v23  ;;  %v645_v38 = vmul.f32 (%p24_p0), 0.00390625, %v96_v23  ;;  %v138_v23 = vld [vmem:[%s713_s2 + $0x10] sm:$0xff] (%p24_p0) }
  0xff   : > { %v719_v7 = vmov %v112_v25  ;;  %v120_v42 = vmul.f32 (%p24_p0), 0.00390625, %v112_v25  ;;  %v124_v46 = vmul.f32 (%p24_p0), %v645_v38, %v645_v38 }
 0x100   : > { %v93_v26 = vpop.xlane.xlu1 %92 }
 0x101   : > { %v98_v27 = vadd.f32 %v518_v9, %v93_v26   ;;  %v128_v50 = vsub.f32 (%p24_p0), %v120_v42, %v124_v46  ;;  %v139_v26 = vld [vmem:[%s713_s2 + $0x18] sm:$0xff] (%p24_p0)  ;;  %v190_v42 = vld [vmem:[%s714_s3 + $0x10] sm:$0xff] (%p24_p0) }
 0x102   : > { %v91_v28 = vpop.xlane.xlu0 %90 }
 0x103   : > { %v97_v29 = vadd.f32 %v522_v10, %v91_v28   ;;  %v721_v9 = vmov %v98_v27  ;;  %v649_v40 = vmul.f32 (%p24_p0), 0.00390625, %v98_v27  ;;  %v132_v54 = vmax.f32 (%p24_p0), %v128_v50, 0.0 }
 0x104   : > { %v107_v30 = vpop.xlane.xlu2 %106 }
 0x105   : > { %v113_v31 = vadd.f32 %v506_v6, %v107_v30   ;;  %v722_v10 = vmov %v97_v29  ;;  %v647_v39 = vmul.f32 (%p24_p0), 0.00390625, %v97_v29  ;;  %v126_v48 = vmul.f32 (%p24_p0), %v649_v40, %v649_v40 }
 0x106   :  { %v140_v58 = vadd.f32 (%p24_p0), 1e-05, %v132_v54 }
 0x107   : > { %v718_v6 = vmov %v113_v31  ;;  %v121_v43 = vmul.f32 (%p24_p0), 0.00390625, %v113_v31  ;;  %v125_v47 = vmul.f32 (%p24_p0), %v647_v39, %v647_v39 }
 0x108   : > { %v95_v32 = vpop.xlane.xlu1 %94  ;;  %419 = vrsqrt.f32 (%p24_p0), %v140_v58  ;;  %vm150_vm1 = vweird.f32 (%p24_p0), %v140_v58 }
 0x109   : > { %v99_v33 = vadd.f32 %v514_v8, %v95_v32   ;;  %v129_v51 = vsub.f32 (%p24_p0), %v121_v43, %v125_v47  ;;  %v188_v32 = vld [vmem:[%s714_s3] sm:$0xff] (%p24_p0) }
 0x10a   : > { %v109_v34 = vpop.xlane.xlu0 %108 }
 0x10b   : > { %v114_v35 = vadd.f32 %v502_v5, %v109_v34   ;;  %v720_v8 = vmov %v99_v33  ;;  %v651_v41 = vmul.f32 (%p24_p0), 0.00390625, %v99_v33  ;;  %v133_v55 = vmax.f32 (%p24_p0), %v129_v51, 0.0 }
 0x10d   : > { %v717_v5 = vmov %v114_v35  ;;  %v122_v44 = vmul.f32 (%p24_p0), 0.00390625, %v114_v35  ;;  %v127_v49 = vmul.f32 (%p24_p0), %v651_v41, %v651_v41  ;;  %v141_v59 = vadd.f32 (%p24_p0), 1e-05, %v133_v55  ;;  %v189_v35 = vld [vmem:[%s714_s3 + $0x8] sm:$0xff] (%p24_p0) }
 0x10e   :  { %v420_v62 = vpop.eup (%p24_p0), %419 }
 0x10f   :  { %26 = sbr.rel (!%p24_p0) target bundleno = 3 (0x3), region = 53  ;;  %v130_v52 = vsub.f32 (%p24_p0), %v122_v44, %v126_v48  ;;  %421 = vrsqrt.f32 (%p24_p0), %v141_v59  ;;  %v145_v0 = vmul.f32 (%p24_p0), %v420_v62, %v140_v58  ;;  %vm151_vm2 = vweird.f32 (%p24_p0), %v420_v62  ;;  %v191_v44 = vld [vmem:[%s714_s3 + $0x18] sm:$0xff] (%p24_p0) }
 0x110   : > { %v111_v36 = vpop.xlane.xlu1 %110  ;;  %vm160_vm3 = vweird.f32 (%p24_p0), %v141_v59  ;;  %vm661_vm7 = vmor (%p24_p0), %vm150_vm1, %vm151_vm2 }
 0x111   : > { %v115_v37 = vadd.f32 %v498_v4, %v111_v36   ;;  %v134_v56 = vmax.f32 (%p24_p0), %v130_v52, 0.0 }
 0x113   : > { %v716_v4 = vmov %v115_v37  ;;  %v123_v45 = vmul.f32 (%p24_p0), 0.00390625, %v115_v37  ;;  %v142_v60 = vadd.f32 (%p24_p0), 1e-05, %v134_v56 }
 0x114   :  { %v146_v4 = vmul.f32 %v420_v62, %v145_v0 }
 0x115   :  { %v131_v53 = vsub.f32 %v123_v45, %v127_v49  ;;  %423 = vrsqrt.f32 %v142_v60  ;;  %v422_v63 = vpop.eup %421  ;;  %vm170_vm5 = vweird.f32 %v142_v60 }
 0x116   :  { %v155_v2 = vmul.f32 %v422_v63, %v141_v59  ;;  %v147_v8 = vmul.f32 0.5, %v146_v4  ;;  %vm161_vm4 = vweird.f32 %v422_v63 }
 0x117   :  { %v135_v57 = vmax.f32 %v131_v53, 0.0  ;;  %vm162_vm10 = vmor %vm160_vm3, %vm161_vm4 }
 0x118   :  { %v156_v6 = vmul.f32 %v422_v63, %v155_v2  ;;  %v148_v12 = vsub.f32 1.5, %v147_v8 }
 0x119   :  { %v143_v61 = vadd.f32 1e-05, %v135_v57 }
 0x11a   :  { %v157_v10 = vmul.f32 0.5, %v156_v6  ;;  %v149_v18 = vmul.f32 %v420_v62, %v148_v12 }
 0x11b   :  { %425 = vrsqrt.f32 %v143_v61  ;;  %v424_v1 = vpop.eup %423  ;;  %vm180_vm8 = vweird.f32 %v143_v61 }
 0x11c   :  { %v165_v5 = vmul.f32 %v424_v1, %v142_v60  ;;  %vm171_vm6 = vweird.f32 %v424_v1  ;;  %v158_v15 = vsub.f32 1.5, %v157_v10  ;;  %v153_v24 = vsel %vm661_vm7, %v420_v62, %v149_v18 }
 0x11d   :  { %vm172_vm11 = vmor %vm170_vm5, %vm171_vm6  ;;  %v679_v29 = vmul.f32 %v153_v24, %v136_v17 }
 0x11e   :  { %v166_v9 = vmul.f32 %v424_v1, %v165_v5  ;;  %v159_v21 = vmul.f32 %v422_v63, %v158_v15 }
 0x11f   :  { %v192_v36 = vmul.f32 %v679_v29, %v645_v38 }
 0x120   :  { %v167_v13 = vmul.f32 0.5, %v166_v9  ;;  %v163_v27 = vsel %vm162_vm10, %v422_v63, %v159_v21 }
 0x121   :  { %v426_v3 = vpop.eup %425  ;;  %v185_v31 = vmul.f32 %v163_v27, %v137_v20  ;;  %v196_v46 = vsub.f32 %v188_v32, %v192_v36 }
 0x122   :  { %v175_v7 = vmul.f32 %v426_v3, %v143_v61  ;;  %vm181_vm9 = vweird.f32 %v426_v3  ;;  %v168_v19 = vsub.f32 1.5, %v167_v13 }
 0x123   :  { %vm182_vm12 = vmor %vm180_vm8, %vm181_vm9  ;;  %v193_v43 = vmul.f32 %v185_v31, %v647_v39 }
 0x124   :  { %v176_v11 = vmul.f32 %v426_v3, %v175_v7  ;;  %v169_v25 = vmul.f32 %v424_v1, %v168_v19 }
 0x125   :  { %v197_v48 = vsub.f32 %v189_v35, %v193_v43 }
 0x126   :  { %v177_v16 = vmul.f32 0.5, %v176_v11  ;;  %v173_v30 = vsel %vm172_vm11, %v424_v1, %v169_v25 }
 0x127   :  { %v186_v34 = vmul.f32 %v173_v30, %v138_v23 }
 0x128   :  { %v178_v22 = vsub.f32 1.5, %v177_v16 }
 0x129   :  { %v194_v45 = vmul.f32 %v186_v34, %v649_v40 }
 0x12a   :  { %v179_v28 = vmul.f32 %v426_v3, %v178_v22 }
 0x12b   :  { %v198_v49 = vsub.f32 %v190_v42, %v194_v45 }
 0x12c   :  { %v183_v33 = vsel %vm182_vm12, %v426_v3, %v179_v28 }
 0x12d   :  { %v187_v37 = vmul.f32 %v183_v33, %v139_v26 }
 0x12f   :  { %v195_v47 = vmul.f32 %v187_v37, %v651_v41 }
 0x131   :  { %v199_v50 = vsub.f32 %v191_v44, %v195_v47 }
 0x132 LB: > { %v536_v38 = vmov 0   ;;  %s328_s3 = sshll.u32 %s534_s17, 5  ;;  %s205_s17 = sadd.s32 1, %s534_s17   ;;  %s534_s17 = sphi %s698_s17, %s205_s17  }
 0x133   : > { %428 = vset.pattern.permute.xlu1 %v536_v38  ;;  %427 = vset.pattern.permute.xlu0 %v536_v38  ;;  %s207_s18 = scalar_lea.vmem [#allocation2], %s328_s3  ;;  %p202_p1 = scmp.ge.s32.totalorder %s205_s17, 2  }
 0x134   : > { %224 = vperm.xlu1 %428, %v186_v34   ;;  %214 = vperm.xlu0 %427, %v679_v29   ;;  %v208_v39 = vld [vmem:[%s207_s18] sm:$0xff]  ;;  %v209_v54 = vld [vmem:[%s207_s18 + $0x8] sm:$0xff]  ;;  %v210_v60 = vld [vmem:[%s207_s18 + $0x10] sm:$0xff]  ;;  %s270_s21 = sshll.u32 (%p202_p1), %s715_s4, 4  ;;  %s537_s22 = smov (%p202_p1), [#allocation2]   ;;  %s271_s21 = int_to_ptr.hbm [resolvable:$true] %s270_s21 }
 0x135   : > { %429 = vset.pattern.permute.xlu2 %v536_v38  ;;  %v211_v61 = vld [vmem:[%s207_s18 + $0x18] sm:$0xff]  ;;  %s268_s23 = sshll.u32 (%p202_p1), %s537_s22, 4  ;;  %s538_s1 = smov (%p202_p1), 128   ;;  %s269_s23 = int_to_ptr.vmem [resolvable:$true] %s268_s23 }
 0x136   : > { %238 = vperm.xlu2 %429, %v196_v46   ;;  %s539_s24 = smov (%p202_p1), 8  }
 0x13c   : > { %229 = vperm.xlu1 %428, %v187_v37   ;;  %219 = vperm.xlu0 %427, %v185_v31  }
 0x13e   : > { %243 = vperm.xlu2 %429, %v197_v48  }
 0x144   : > { %253 = vperm.xlu1 %428, %v199_v50   ;;  %248 = vperm.xlu0 %427, %v198_v49  }
 0x190   : > { %v239_v40 = vpop.permute.xlu2 %238 }
 0x198   : > { %v244_v58 = vpop.permute.xlu2 %243 }
 0x1a6   : > { %v225_v41 = vpop.permute.xlu1 %224  ;;  %v215_v51 = vpop.permute.xlu0 %214 }
 0x1a7   : > { %v232_v52 = vmul.f32 %v215_v51, %v208_v39  ;;  %v234_v62 = vmul.f32 %v225_v41, %v210_v60 }
 0x1a9   : > { %v256_v53 = vadd.f32 %v239_v40, %v232_v52 }
 0x1ab   : > { %260 = vst [vmem:[%s207_s18] sm:$0xff] %v256_v53 }
 0x1ae   : > { %v230_v55 = vpop.permute.xlu1 %229  ;;  %v220_v56 = vpop.permute.xlu0 %219 }
 0x1af   : > { %v233_v57 = vmul.f32 %v220_v56, %v209_v54  ;;  %v235_v63 = vmul.f32 %v230_v55, %v211_v61 }
 0x1b1   : > { %v257_v59 = vadd.f32 %v244_v58, %v233_v57 }
 0x1b3   : > { %261 = vst [vmem:[%s207_s18 + $0x8] sm:$0xff] %v257_v59 }
 0x1b6   : > { %v254_v0 = vpop.permute.xlu1 %253  ;;  %v249_v1 = vpop.permute.xlu0 %248  ;;  %204 = sbr.rel (!%p202_p1) target bundleno = 306 (0x132), region = 64 }
 0x1b7   : > { %v259_v2 = vadd.f32 %v254_v0, %v235_v63  ;;  %v258_v3 = vadd.f32 %v249_v1, %v234_v62 }
 0x1b9   : > { %263 = vst [vmem:[%s207_s18 + $0x18] sm:$0xff] %v259_v2 }
 0x1ba   : > { %262 = vst [vmem:[%s207_s18 + $0x10] sm:$0xff] %v258_v3 }
 0x1bb   :  { %276 = dma.vmem_to_hbm [thread:$0]  %s269_s23, 1024, %s271_s21, [#allocation3], %s538_s1, %s538_s1, %s539_s24  }
 0x1bc   :  { %494 = dma.done.wait [#allocation3], 1024  }
 0x1bd   :  { %495 = vsyncadd [#allocation3], 4294966272 }
 0x1be   :  { %281 = vsyncpa [#allocation3], 1 }

</bundles_post_ra>
